<compile_context>
chip_gen: v5e
topology: v5e:2x2
jax: 0.10.0
libtpu: 0.0.40
codegen_flags: <defaults>
</compile_context>

<pallas_src>
import functools

import jax
import jax.numpy as jnp
from jax.experimental import pallas as pl
from jax.experimental.pallas import tpu as pltpu


# --------------------------------------------------------------------------- #
# Kernel
# --------------------------------------------------------------------------- #
def _mm_loss_kernel(traj_ref, pred_ref, conf_ref, mask_ref, best_ref, loss_ref):
    # traj_ref : (M, K, TN)  native dtype    pred_ref : (K, TN) native dtype
    # conf_ref : (M, 1, TN)  native dtype    mask_ref : (1, TN) f32
    # best_ref : (K, TN)     native dtype    loss_ref : (1, 1, 2) f32 per-tile partials
    M = traj_ref.shape[0]
    K = traj_ref.shape[1]
    inv_k = jnp.float32(1.0 / K)
    one = jnp.float32(1.0)
    half = jnp.float32(0.5)

    pred = pred_ref[...].astype(jnp.float32)                  # (K, TN)
    ones_row = jnp.ones((1, K), dtype=jnp.float32)

    def huber_sum(t):
        # Branch-free Huber (delta = 1), summed over the feature axis.
        d = t - pred
        ad = jnp.abs(d)
        c = jnp.minimum(ad, one)
        hub = c * (ad - half * c)                              # fused: c*|d| - 0.5*c*c
        # K-reduction on the otherwise-idle MXU; HIGHEST keeps full f32 accuracy.
        return jnp.dot(ones_row, hub,
                       precision=jax.lax.Precision.HIGHEST,
                       preferred_element_type=jnp.float32)     # (1, TN)

    # Mode 0 initializes the running state.  Only (1, TN) rows are carried across
    # the unrolled loop (no (K, TN) best carry -> less vreg/spill pressure).
    min_loss = huber_sum(traj_ref[0].astype(jnp.float32))      # (1, TN)
    best_idx = jnp.zeros_like(min_loss)                        # (1, TN) winning mode id
    c0 = conf_ref[0].astype(jnp.float32)                       # (1, TN)
    target_logit = c0
    cmax = c0

    # Statically unrolled over the tiny modal axis: pure VPU compare / selects.
    for m in range(1, M):
        loss_m = huber_sum(traj_ref[m].astype(jnp.float32))
        cm = conf_ref[m].astype(jnp.float32)
        better = loss_m < min_loss                             # strict < : first-occurrence argmin
        min_loss = jnp.where(better, loss_m, min_loss)
        best_idx = jnp.where(better, jnp.float32(m), best_idx)
        target_logit = jnp.where(better, cm, target_logit)
        cmax = jnp.maximum(cmax, cm)

    # Materialize the best-mode trajectory (native dtype) in one pass of selects;
    # traj tiles are re-read from VMEM (cheap) instead of being carried in vregs.
    best = traj_ref[0]
    for m in range(1, M):
        best = jnp.where(best_idx == jnp.float32(m), traj_ref[m], best)
    best_ref[...] = best                                       # lane-dense unmasked store

    # Stable log-sum-exp over modes (unrolled: EUP exp + VPU adds).
    esum = jnp.exp(c0 - cmax)
    for m in range(1, M):
        esum = esum + jnp.exp(conf_ref[m].astype(jnp.float32) - cmax)
    ce = jnp.log(esum) + cmax - target_logit                   # (1, TN) cross-entropy

    msk = mask_ref[...]                                        # (1, TN) f32
    # Fold the 1/K of the Huber mean into the scalar partial (off the hot path).
    tl = jnp.sum(min_loss * msk, axis=-1, keepdims=True) * inv_k   # (1, 1)
    cl = jnp.sum(ce * msk, axis=-1, keepdims=True)                  # (1, 1)
    lane = jax.lax.broadcasted_iota(jnp.int32, (1, 2), 1)
    loss_ref[0] = jnp.where(lane == 0, tl, cl)                 # single (1, 2) partial store


# --------------------------------------------------------------------------- #
# Wrapper
# --------------------------------------------------------------------------- #
def _choose_tile_n(n, m, k, itemsize, budget_bytes=24 * 1024 * 1024, max_tile=4096):
    """Largest multiple-of-128 N-tile whose double-buffered working set fits a
    conservative VMEM budget (safe on v5e/v6e 128 MiB and v7x 64 MiB)."""
    # traj + pred + best (native dtype)  +  conf (native)  +  mask/partials (f32)
    bytes_per_col = itemsize * (m * k + 2 * k + m) + 4 * 3
    cap = (budget_bytes // (2 * bytes_per_col)) // 128 * 128
    cap = max(128, min(cap, max_tile))
    need = ((n + 127) // 128) * 128                            # don't over-pad tiny N
    return int(min(cap, need))


@jax.jit
def multimodal_loss(traj, confidence, predicted_future_traj, predicted_traj_mask):
    """traj: (B, O, M, F, D); confidence: (B, O, M);
    predicted_future_traj: (B, O, F, D); predicted_traj_mask: (B, O)."""
    B, O, M, F, D = traj.shape
    N, K = B * O, F * D
    in_dtype = traj.dtype

    tile_n = _choose_tile_n(N, M, K, jnp.dtype(in_dtype).itemsize)
    num_tiles = -(-N // tile_n)
    n_pad = num_tiles * tile_n

    # Lane-dense transposed layouts (N on the lane axis), kept in the NATIVE dtype
    # so the relayout + kernel DMAs move the minimum number of HBM bytes.
    # TODO(synk): the (N,M,K)->(M,K,N) relayout is an extra HBM pass; push this
    # layout upstream into the producer of `traj` to eliminate it entirely.
    traj_t = jnp.transpose(traj.reshape(N, M, K), (1, 2, 0))                      # (M, K, N)
    pred_t = jnp.transpose(predicted_future_traj.reshape(N, K), (1, 0))           # (K, N)
    conf_t = jnp.transpose(confidence.reshape(N, M), (1, 0))[:, None, :]          # (M, 1, N)
    mask_t = predicted_traj_mask.reshape(1, N).astype(jnp.float32)                # (1, N)

    pad = n_pad - N
    if pad:
        traj_t = jnp.pad(traj_t, ((0, 0), (0, 0), (0, pad)))
        pred_t = jnp.pad(pred_t, ((0, 0), (0, pad)))
        conf_t = jnp.pad(conf_t, ((0, 0), (0, 0), (0, pad)))
        mask_t = jnp.pad(mask_t, ((0, 0), (0, pad)))   # zero mask -> padded cols contribute 0

    best_t, loss_p = pl.pallas_call(
        _mm_loss_kernel,
        out_shape=(
            jax.ShapeDtypeStruct((K, n_pad), in_dtype),            # best trajectory (transposed)
            jax.ShapeDtypeStruct((num_tiles, 1, 2), jnp.float32),  # [traj, conf] per-tile partials
        ),
        grid=(num_tiles,),
        in_specs=[
            pl.BlockSpec((M, K, tile_n), lambda i: (0, 0, i)),
            pl.BlockSpec((K, tile_n), lambda i: (0, i)),
            pl.BlockSpec((M, 1, tile_n), lambda i: (0, 0, i)),
            pl.BlockSpec((1, tile_n), lambda i: (0, i)),
        ],
        out_specs=(
            pl.BlockSpec((K, tile_n), lambda i: (0, i)),
            pl.BlockSpec((1, 1, 2), lambda i: (i, 0, 0)),
        ),
        compiler_params=pltpu.CompilerParams(
            dimension_semantics=("parallel",),          # shards the N loop across TCs on v7x
            vmem_limit_bytes=32 * 1024 * 1024,
        ),
    )(traj_t, pred_t, conf_t, mask_t)

    denom = jnp.sum(predicted_traj_mask.astype(jnp.float32)) + jnp.float32(1e-5)
    traj_loss = jnp.sum(loss_p[:, 0, 0]) / denom
    conf_loss = jnp.sum(loss_p[:, 0, 1]) / denom
    best = jnp.transpose(best_t[:, :N], (1, 0)).reshape(B, O, F, D)
    return traj_loss, conf_loss, best


# --------------------------------------------------------------------------- #
# Pure-JAX reference (PyTorch forward semantics) for validation
# --------------------------------------------------------------------------- #
def _reference(traj, confidence, predicted_future_traj, predicted_traj_mask):
    B, O, M, F, D = traj.shape
    pred = predicted_future_traj[:, :, None, :, :]
    d = traj - pred
    ad = jnp.abs(d)
    hub = jnp.where(ad < 1.0, 0.5 * d * d, ad - 0.5)
    loss = jnp.mean(hub.reshape(B, O, M, -1), axis=-1)
    min_loss = jnp.min(loss, axis=-1)
    am = jnp.argmin(loss, axis=-1)
    best = jnp.take_along_axis(traj, am[:, :, None, None, None], axis=2)[:, :, 0]
    logp = jax.nn.log_softmax(confidence.reshape(-1, M), axis=-1)
    ce = -jnp.take_along_axis(logp, am.reshape(-1, 1), axis=-1).reshape(B, O)
    denom = jnp.sum(predicted_traj_mask) + 1e-5
    return (jnp.sum(min_loss * predicted_traj_mask) / denom,
            jnp.sum(ce * predicted_traj_mask) / denom,
            best)


if __name__ == "__main__":
    B, O, M, F, D = 2, 8, 4, 8, 2  # batch, obs_num, multimodal, future_step, output_dim

    key = jax.random.PRNGKey(0)
    k1, k2, k3, k4 = jax.random.split(key, 4)
    traj = jax.random.normal(k1, (B, O, M, F, D), dtype=jnp.float32)
    confidence = jax.random.normal(k2, (B, O, M), dtype=jnp.float32)
    predicted_future_traj = jax.random.normal(k3, (B, O, F, D), dtype=jnp.float32)
    predicted_traj_mask = (jax.random.uniform(k4, (B, O)) > 0.3).astype(jnp.float32)

    traj_loss, conf_loss, best_traj = jax.block_until_ready(
        multimodal_loss(traj, confidence, predicted_future_traj, predicted_traj_mask))

    ref_tl, ref_cl, ref_bt = _reference(
        traj, confidence, predicted_future_traj, predicted_traj_mask)

    assert jnp.allclose(traj_loss, ref_tl, atol=1e-5, rtol=1e-5), (traj_loss, ref_tl)
    assert jnp.allclose(conf_loss, ref_cl, atol=1e-5, rtol=1e-5), (conf_loss, ref_cl)
    assert jnp.allclose(best_traj, ref_bt, atol=1e-6), "best-mode trajectory mismatch"

    print("KERNEL_OK")
</pallas_src>

<mosaic_0001>
module attributes {stable_mosaic.version = 11 : i64} {
  func.func @_mm_loss_kernel(%arg0: i32, %arg1: memref<4x16x128xf32, #tpu.memory_space<vmem>>, %arg2: memref<16x128xf32, #tpu.memory_space<vmem>>, %arg3: memref<4x1x128xf32, #tpu.memory_space<vmem>>, %arg4: memref<1x128xf32, #tpu.memory_space<vmem>>, %arg5: memref<16x128xf32, #tpu.memory_space<vmem>>, %arg6: memref<1x1x2xf32, #tpu.memory_space<vmem>>) attributes {dimension_semantics = [#tpu.dimension_semantics<parallel>], iteration_bounds = array<i64: 1>, scalar_prefetch = 0 : i64, scratch_operands = 0 : i64, tpu.core_type = #tpu.core_type<tc>, window_params = [{transform_indices = @transform_0, window_bounds = array<i64: 4, 16, 128>}, {transform_indices = @transform_1, window_bounds = array<i64: 16, 128>}, {transform_indices = @transform_2, window_bounds = array<i64: 4, 1, 128>}, {transform_indices = @transform_3, window_bounds = array<i64: 1, 128>}, {transform_indices = @transform_4, window_bounds = array<i64: 16, 128>}, {transform_indices = @transform_5, window_bounds = array<i64: 1, 1, 2>}]} {
    %c0 = arith.constant 0 : index
    %c0_0 = arith.constant 0 : index
    %0 = vector.load %arg2[%c0, %c0_0] : memref<16x128xf32, #tpu.memory_space<vmem>>, vector<16x128xf32>
    %cst = arith.constant 1.000000e+00 : f32
    %1 = vector.broadcast %cst : f32 to vector<1x16xf32>
    %c0_1 = arith.constant 0 : index
    %c0_2 = arith.constant 0 : index
    %c0_3 = arith.constant 0 : index
    %2 = vector.load %arg1[%c0_1, %c0_2, %c0_3] : memref<4x16x128xf32, #tpu.memory_space<vmem>>, vector<1x16x128xf32>
    %3 = vector.shape_cast %2 : vector<1x16x128xf32> to vector<16x128xf32>
    %4 = arith.subf %3, %0 : vector<16x128xf32>
    %5 = math.absf %4 : vector<16x128xf32>
    %cst_4 = arith.constant 1.000000e+00 : f32
    %6 = vector.broadcast %cst_4 : f32 to vector<16x128xf32>
    %7 = arith.minimumf %5, %6 : vector<16x128xf32>
    %cst_5 = arith.constant 5.000000e-01 : f32
    %8 = vector.broadcast %cst_5 : f32 to vector<16x128xf32>
    %9 = arith.mulf %8, %7 : vector<16x128xf32>
    %10 = arith.subf %5, %9 : vector<16x128xf32>
    %11 = arith.mulf %7, %10 : vector<16x128xf32>
    %cst_6 = arith.constant dense<0.000000e+00> : vector<1x128xf32>
    %12 = tpu.matmul %1, %11, %cst_6 {dimension_numbers = #tpu.dot_dimension_numbers<[1], [0], [0], [1], [0, 0, 1, 1], [], []>, precision = #tpu.contract_precision<fp32>} : vector<1x16xf32>, vector<16x128xf32>, vector<1x128xf32> -> vector<1x128xf32>
    %cst_7 = arith.constant 0.000000e+00 : f32
    %13 = vector.broadcast %cst_7 : f32 to vector<1x128xf32>
    %c0_8 = arith.constant 0 : index
    %c0_9 = arith.constant 0 : index
    %c0_10 = arith.constant 0 : index
    %14 = vector.load %arg3[%c0_8, %c0_9, %c0_10] : memref<4x1x128xf32, #tpu.memory_space<vmem>>, vector<1x1x128xf32>
    %15 = vector.shape_cast %14 : vector<1x1x128xf32> to vector<1x128xf32>
    %c1 = arith.constant 1 : index
    %c0_11 = arith.constant 0 : index
    %c0_12 = arith.constant 0 : index
    %16 = vector.load %arg1[%c1, %c0_11, %c0_12] : memref<4x16x128xf32, #tpu.memory_space<vmem>>, vector<1x16x128xf32>
    %17 = vector.shape_cast %16 : vector<1x16x128xf32> to vector<16x128xf32>
    %18 = arith.subf %17, %0 : vector<16x128xf32>
    %19 = math.absf %18 : vector<16x128xf32>
    %cst_13 = arith.constant 1.000000e+00 : f32
    %20 = vector.broadcast %cst_13 : f32 to vector<16x128xf32>
    %21 = arith.minimumf %19, %20 : vector<16x128xf32>
    %cst_14 = arith.constant 5.000000e-01 : f32
    %22 = vector.broadcast %cst_14 : f32 to vector<16x128xf32>
    %23 = arith.mulf %22, %21 : vector<16x128xf32>
    %24 = arith.subf %19, %23 : vector<16x128xf32>
    %25 = arith.mulf %21, %24 : vector<16x128xf32>
    %cst_15 = arith.constant dense<0.000000e+00> : vector<1x128xf32>
    %26 = tpu.matmul %1, %25, %cst_15 {dimension_numbers = #tpu.dot_dimension_numbers<[1], [0], [0], [1], [0, 0, 1, 1], [], []>, precision = #tpu.contract_precision<fp32>} : vector<1x16xf32>, vector<16x128xf32>, vector<1x128xf32> -> vector<1x128xf32>
    %c1_16 = arith.constant 1 : index
    %c0_17 = arith.constant 0 : index
    %c0_18 = arith.constant 0 : index
    %27 = vector.load %arg3[%c1_16, %c0_17, %c0_18] : memref<4x1x128xf32, #tpu.memory_space<vmem>>, vector<1x1x128xf32>
    %28 = vector.shape_cast %27 : vector<1x1x128xf32> to vector<1x128xf32>
    %29 = arith.cmpf olt, %26, %12 : vector<1x128xf32>
    %30 = arith.select %29, %26, %12 : vector<1x128xi1>, vector<1x128xf32>
    %cst_19 = arith.constant 1.000000e+00 : f32
    %31 = vector.broadcast %cst_19 : f32 to vector<1x128xf32>
    %32 = arith.select %29, %31, %13 : vector<1x128xi1>, vector<1x128xf32>
    %33 = arith.select %29, %28, %15 : vector<1x128xi1>, vector<1x128xf32>
    %34 = arith.maximumf %15, %28 : vector<1x128xf32>
    %c2 = arith.constant 2 : index
    %c0_20 = arith.constant 0 : index
    %c0_21 = arith.constant 0 : index
    %35 = vector.load %arg1[%c2, %c0_20, %c0_21] : memref<4x16x128xf32, #tpu.memory_space<vmem>>, vector<1x16x128xf32>
    %36 = vector.shape_cast %35 : vector<1x16x128xf32> to vector<16x128xf32>
    %37 = arith.subf %36, %0 : vector<16x128xf32>
    %38 = math.absf %37 : vector<16x128xf32>
    %cst_22 = arith.constant 1.000000e+00 : f32
    %39 = vector.broadcast %cst_22 : f32 to vector<16x128xf32>
    %40 = arith.minimumf %38, %39 : vector<16x128xf32>
    %cst_23 = arith.constant 5.000000e-01 : f32
    %41 = vector.broadcast %cst_23 : f32 to vector<16x128xf32>
    %42 = arith.mulf %41, %40 : vector<16x128xf32>
    %43 = arith.subf %38, %42 : vector<16x128xf32>
    %44 = arith.mulf %40, %43 : vector<16x128xf32>
    %cst_24 = arith.constant dense<0.000000e+00> : vector<1x128xf32>
    %45 = tpu.matmul %1, %44, %cst_24 {dimension_numbers = #tpu.dot_dimension_numbers<[1], [0], [0], [1], [0, 0, 1, 1], [], []>, precision = #tpu.contract_precision<fp32>} : vector<1x16xf32>, vector<16x128xf32>, vector<1x128xf32> -> vector<1x128xf32>
    %c2_25 = arith.constant 2 : index
    %c0_26 = arith.constant 0 : index
    %c0_27 = arith.constant 0 : index
    %46 = vector.load %arg3[%c2_25, %c0_26, %c0_27] : memref<4x1x128xf32, #tpu.memory_space<vmem>>, vector<1x1x128xf32>
    %47 = vector.shape_cast %46 : vector<1x1x128xf32> to vector<1x128xf32>
    %48 = arith.cmpf olt, %45, %30 : vector<1x128xf32>
    %49 = arith.select %48, %45, %30 : vector<1x128xi1>, vector<1x128xf32>
    %cst_28 = arith.constant 2.000000e+00 : f32
    %50 = vector.broadcast %cst_28 : f32 to vector<1x128xf32>
    %51 = arith.select %48, %50, %32 : vector<1x128xi1>, vector<1x128xf32>
    %52 = arith.select %48, %47, %33 : vector<1x128xi1>, vector<1x128xf32>
    %53 = arith.maximumf %34, %47 : vector<1x128xf32>
    %c3 = arith.constant 3 : index
    %c0_29 = arith.constant 0 : index
    %c0_30 = arith.constant 0 : index
    %54 = vector.load %arg1[%c3, %c0_29, %c0_30] : memref<4x16x128xf32, #tpu.memory_space<vmem>>, vector<1x16x128xf32>
    %55 = vector.shape_cast %54 : vector<1x16x128xf32> to vector<16x128xf32>
    %56 = arith.subf %55, %0 : vector<16x128xf32>
    %57 = math.absf %56 : vector<16x128xf32>
    %cst_31 = arith.constant 1.000000e+00 : f32
    %58 = vector.broadcast %cst_31 : f32 to vector<16x128xf32>
    %59 = arith.minimumf %57, %58 : vector<16x128xf32>
    %cst_32 = arith.constant 5.000000e-01 : f32
    %60 = vector.broadcast %cst_32 : f32 to vector<16x128xf32>
    %61 = arith.mulf %60, %59 : vector<16x128xf32>
    %62 = arith.subf %57, %61 : vector<16x128xf32>
    %63 = arith.mulf %59, %62 : vector<16x128xf32>
    %cst_33 = arith.constant dense<0.000000e+00> : vector<1x128xf32>
    %64 = tpu.matmul %1, %63, %cst_33 {dimension_numbers = #tpu.dot_dimension_numbers<[1], [0], [0], [1], [0, 0, 1, 1], [], []>, precision = #tpu.contract_precision<fp32>} : vector<1x16xf32>, vector<16x128xf32>, vector<1x128xf32> -> vector<1x128xf32>
    %c3_34 = arith.constant 3 : index
    %c0_35 = arith.constant 0 : index
    %c0_36 = arith.constant 0 : index
    %65 = vector.load %arg3[%c3_34, %c0_35, %c0_36] : memref<4x1x128xf32, #tpu.memory_space<vmem>>, vector<1x1x128xf32>
    %66 = vector.shape_cast %65 : vector<1x1x128xf32> to vector<1x128xf32>
    %67 = arith.cmpf olt, %64, %49 : vector<1x128xf32>
    %68 = arith.select %67, %64, %49 : vector<1x128xi1>, vector<1x128xf32>
    %cst_37 = arith.constant 3.000000e+00 : f32
    %69 = vector.broadcast %cst_37 : f32 to vector<1x128xf32>
    %70 = arith.select %67, %69, %51 : vector<1x128xi1>, vector<1x128xf32>
    %71 = arith.select %67, %66, %52 : vector<1x128xi1>, vector<1x128xf32>
    %72 = arith.maximumf %53, %66 : vector<1x128xf32>
    %c0_38 = arith.constant 0 : index
    %c0_39 = arith.constant 0 : index
    %c0_40 = arith.constant 0 : index
    %73 = vector.load %arg1[%c0_38, %c0_39, %c0_40] : memref<4x16x128xf32, #tpu.memory_space<vmem>>, vector<1x16x128xf32>
    %74 = vector.shape_cast %73 : vector<1x16x128xf32> to vector<16x128xf32>
    %cst_41 = arith.constant 1.000000e+00 : f32
    %75 = vector.broadcast %cst_41 : f32 to vector<1x128xf32>
    %76 = arith.cmpf oeq, %70, %75 : vector<1x128xf32>
    %c1_42 = arith.constant 1 : index
    %c0_43 = arith.constant 0 : index
    %c0_44 = arith.constant 0 : index
    %77 = vector.load %arg1[%c1_42, %c0_43, %c0_44] : memref<4x16x128xf32, #tpu.memory_space<vmem>>, vector<1x16x128xf32>
    %78 = vector.shape_cast %77 : vector<1x16x128xf32> to vector<16x128xf32>
    %79 = vector.shape_cast %76 : vector<1x128xi1> to vector<1x128xi1>
    %80 = vector.broadcast %79 : vector<1x128xi1> to vector<16x128xi1>
    %81 = arith.select %80, %78, %74 : vector<16x128xi1>, vector<16x128xf32>
    %cst_45 = arith.constant 2.000000e+00 : f32
    %82 = vector.broadcast %cst_45 : f32 to vector<1x128xf32>
    %83 = arith.cmpf oeq, %70, %82 : vector<1x128xf32>
    %c2_46 = arith.constant 2 : index
    %c0_47 = arith.constant 0 : index
    %c0_48 = arith.constant 0 : index
    %84 = vector.load %arg1[%c2_46, %c0_47, %c0_48] : memref<4x16x128xf32, #tpu.memory_space<vmem>>, vector<1x16x128xf32>
    %85 = vector.shape_cast %84 : vector<1x16x128xf32> to vector<16x128xf32>
    %86 = vector.shape_cast %83 : vector<1x128xi1> to vector<1x128xi1>
    %87 = vector.broadcast %86 : vector<1x128xi1> to vector<16x128xi1>
    %88 = arith.select %87, %85, %81 : vector<16x128xi1>, vector<16x128xf32>
    %cst_49 = arith.constant 3.000000e+00 : f32
    %89 = vector.broadcast %cst_49 : f32 to vector<1x128xf32>
    %90 = arith.cmpf oeq, %70, %89 : vector<1x128xf32>
    %c3_50 = arith.constant 3 : index
    %c0_51 = arith.constant 0 : index
    %c0_52 = arith.constant 0 : index
    %91 = vector.load %arg1[%c3_50, %c0_51, %c0_52] : memref<4x16x128xf32, #tpu.memory_space<vmem>>, vector<1x16x128xf32>
    %92 = vector.shape_cast %91 : vector<1x16x128xf32> to vector<16x128xf32>
    %93 = vector.shape_cast %90 : vector<1x128xi1> to vector<1x128xi1>
    %94 = vector.broadcast %93 : vector<1x128xi1> to vector<16x128xi1>
    %95 = arith.select %94, %92, %88 : vector<16x128xi1>, vector<16x128xf32>
    %c0_53 = arith.constant 0 : index
    %c0_54 = arith.constant 0 : index
    %96 = vector.load %arg5[%c0_53, %c0_54] : memref<16x128xf32, #tpu.memory_space<vmem>>, vector<16x128xf32>
    tpu.vector_store %arg5[%c0_53, %c0_54], %95 {strides = array<i32>} : memref<16x128xf32, #tpu.memory_space<vmem>>, vector<16x128xf32>,
    %97 = arith.subf %15, %72 : vector<1x128xf32>
    %98 = math.exp %97 : vector<1x128xf32>
    %c1_55 = arith.constant 1 : index
    %c0_56 = arith.constant 0 : index
    %c0_57 = arith.constant 0 : index
    %99 = vector.load %arg3[%c1_55, %c0_56, %c0_57] : memref<4x1x128xf32, #tpu.memory_space<vmem>>, vector<1x1x128xf32>
    %100 = vector.shape_cast %99 : vector<1x1x128xf32> to vector<1x128xf32>
    %101 = arith.subf %100, %72 : vector<1x128xf32>
    %102 = math.exp %101 : vector<1x128xf32>
    %103 = arith.addf %98, %102 : vector<1x128xf32>
    %c2_58 = arith.constant 2 : index
    %c0_59 = arith.constant 0 : index
    %c0_60 = arith.constant 0 : index
    %104 = vector.load %arg3[%c2_58, %c0_59, %c0_60] : memref<4x1x128xf32, #tpu.memory_space<vmem>>, vector<1x1x128xf32>
    %105 = vector.shape_cast %104 : vector<1x1x128xf32> to vector<1x128xf32>
    %106 = arith.subf %105, %72 : vector<1x128xf32>
    %107 = math.exp %106 : vector<1x128xf32>
    %108 = arith.addf %103, %107 : vector<1x128xf32>
    %c3_61 = arith.constant 3 : index
    %c0_62 = arith.constant 0 : index
    %c0_63 = arith.constant 0 : index
    %109 = vector.load %arg3[%c3_61, %c0_62, %c0_63] : memref<4x1x128xf32, #tpu.memory_space<vmem>>, vector<1x1x128xf32>
    %110 = vector.shape_cast %109 : vector<1x1x128xf32> to vector<1x128xf32>
    %111 = arith.subf %110, %72 : vector<1x128xf32>
    %112 = math.exp %111 : vector<1x128xf32>
    %113 = arith.addf %108, %112 : vector<1x128xf32>
    %114 = math.log %113 : vector<1x128xf32>
    %115 = arith.addf %114, %72 : vector<1x128xf32>
    %116 = arith.subf %115, %71 : vector<1x128xf32>
    %c0_64 = arith.constant 0 : index
    %c0_65 = arith.constant 0 : index
    %117 = vector.load %arg4[%c0_64, %c0_65] : memref<1x128xf32, #tpu.memory_space<vmem>>, vector<1x128xf32>
    %118 = arith.mulf %68, %117 : vector<1x128xf32>
    %cst_66 = arith.constant dense<0.000000e+00> : vector<1xf32>
    %119 = vector.multi_reduction <add>, %118, %cst_66 [1] : vector<1x128xf32> to vector<1xf32>
    %120 = vector.shape_cast %119 : vector<1xf32> to vector<1x1xf32>
    %cst_67 = arith.constant 6.250000e-02 : f32
    %121 = vector.broadcast %cst_67 : f32 to vector<1x1xf32>
    %122 = arith.mulf %120, %121 : vector<1x1xf32>
    %123 = arith.mulf %116, %117 : vector<1x128xf32>
    %cst_68 = arith.constant dense<0.000000e+00> : vector<1xf32>
    %124 = vector.multi_reduction <add>, %123, %cst_68 [1] : vector<1x128xf32> to vector<1xf32>
    %125 = vector.shape_cast %124 : vector<1xf32> to vector<1x1xf32>
    %126 = tpu.iota {dimensions = array<i32: 1>} : vector<1x2xi32>
    %c0_i32 = arith.constant 0 : i32
    %127 = vector.broadcast %c0_i32 : i32 to vector<1x2xi32>
    %128 = arith.cmpi eq, %126, %127 : vector<1x2xi32>
    %129 = vector.shape_cast %122 : vector<1x1xf32> to vector<1x1xf32>
    %130 = vector.broadcast %129 : vector<1x1xf32> to vector<1x2xf32>
    %131 = vector.shape_cast %125 : vector<1x1xf32> to vector<1x1xf32>
    %132 = vector.broadcast %131 : vector<1x1xf32> to vector<1x2xf32>
    %133 = arith.select %128, %130, %132 : vector<1x2xi1>, vector<1x2xf32>
    %c0_69 = arith.constant 0 : index
    %c0_70 = arith.constant 0 : index
    %c0_71 = arith.constant 0 : index
    %134 = vector.load %arg6[%c0_69, %c0_70, %c0_71] : memref<1x1x2xf32, #tpu.memory_space<vmem>>, vector<1x1x2xf32>
    %135 = vector.shape_cast %134 : vector<1x1x2xf32> to vector<1x2xf32>
    %136 = vector.shape_cast %133 : vector<1x2xf32> to vector<1x1x2xf32>
    tpu.vector_store %arg6[%c0_69, %c0_70, %c0_71], %136 {strides = array<i32>} : memref<1x1x2xf32, #tpu.memory_space<vmem>>, vector<1x1x2xf32>,
    return
  }
  func.func @transform_0(%arg0: i32) -> (i32, i32, i32) {
    %c0_i32 = arith.constant 0 : i32
    %c0_i32_0 = arith.constant 0 : i32
    %c0_i32_1 = arith.constant 0 : i32
    return %c0_i32, %c0_i32_0, %arg0 : i32, i32, i32
  }
  func.func @transform_1(%arg0: i32) -> (i32, i32) {
    %c0_i32 = arith.constant 0 : i32
    %c0_i32_0 = arith.constant 0 : i32
    return %c0_i32, %arg0 : i32, i32
  }
  func.func @transform_2(%arg0: i32) -> (i32, i32, i32) {
    %c0_i32 = arith.constant 0 : i32
    %c0_i32_0 = arith.constant 0 : i32
    %c0_i32_1 = arith.constant 0 : i32
    return %c0_i32, %c0_i32_0, %arg0 : i32, i32, i32
  }
  func.func @transform_3(%arg0: i32) -> (i32, i32) {
    %c0_i32 = arith.constant 0 : i32
    %c0_i32_0 = arith.constant 0 : i32
    return %c0_i32, %arg0 : i32, i32
  }
  func.func @transform_4(%arg0: i32) -> (i32, i32) {
    %c0_i32 = arith.constant 0 : i32
    %c0_i32_0 = arith.constant 0 : i32
    return %c0_i32, %arg0 : i32, i32
  }
  func.func @transform_5(%arg0: i32) -> (i32, i32, i32) {
    %c0_i32 = arith.constant 0 : i32
    %c0_i32_0 = arith.constant 0 : i32
    %c0_i32_1 = arith.constant 0 : i32
    return %arg0, %c0_i32, %c0_i32_0 : i32, i32, i32
  }
}

</mosaic_0001>

<bundles_post_ra>
// kernel: multimodal_loss.1
= control target key start
LH: loop header
LB: loop body
LE: loop exit
PB: predicated region body
PF: predicated region fallthrough
CT: control target
= control target key end

     0   :  { %vm35_vm0 = vcmask 130048   ;;  %v846_v3 = vmov 0   ;;  %vm786_vm4 = vcmask 1040384   ;;  %vm799_vm12 = vcmask 8192   ;;  %s1085_s0 = inlined_call_operand.vmem [shape: f32[4,16,128], index: 0, kind: input, shape index: {}]   ;;  %s1086_s1 = inlined_call_operand.vmem [shape: f32[16,128], index: 1, kind: input, shape index: {}]   ;;  %s1087_s2 = inlined_call_operand.vmem [shape: f32[4,1,128], index: 2, kind: input, shape index: {}]   ;;  %s1088_s3 = inlined_call_operand.vmem [shape: f32[1,128], index: 3, kind: input, shape index: {}]   ;;  %s1089_s4 = inlined_call_operand.vmem [shape: f32[16,128], index: 4, kind: output, shape index: {0}]   ;;  %s1090_s5 = inlined_call_operand.vmem [shape: f32[1,1,2], index: 5, kind: output, shape index: {1}]  }
   0x1   :  { %v20_v0 = vld [vmem:[%s1086_s1 + $0x8] sm:$0xff]  ;;  %v19_v2 = vld [vmem:[%s1086_s1] sm:$0xff]  ;;  %v37_v4 = vsel %vm35_vm0, 1.0, %v846_v3  ;;  %v903_v8 = vld [vmem:[%s1085_s0 + $0x18] sm:$0xff] }
   0x2   :  { %v885_v1 = vld [vmem:[%s1085_s0 + $0x8] sm:$0xff]  ;;  %v896_v6 = vld [vmem:[%s1085_s0] sm:$0xff]  ;;  %v898_v7 = vsub.f32 %v37_v4, %v37_v4  ;;  %v908_v9 = vld [vmem:[%s1085_s0 + $0x10] sm:$0xff]  ;;  %v203_v11 = vsub.f32 %v903_v8, %v20_v0 }
   0x3   :  { %v24_v5 = vsub.f32 %v885_v1, %v20_v0  ;;  %v23_v10 = vsub.f32 %v896_v6, %v19_v2  ;;  %v202_v12 = vsub.f32 %v908_v9, %v19_v2  ;;  %v916_v13 = vld [vmem:[%s1085_s0 + $0x28] sm:$0xff]  ;;  %v921_v14 = vld [vmem:[%s1085_s0 + $0x20] sm:$0xff]  ;;  %v926_v15 = vld [vmem:[%s1085_s0 + $0x38] sm:$0xff] }
   0x4   :  { %v929_v17 = vand.u32 4294901760, %v898_v7  ;;  %v384_v18 = vsub.f32 %v916_v13, %v20_v0  ;;  %v383_v19 = vsub.f32 %v921_v14, %v19_v2  ;;  %v205_v21 = vand.u32 2147483647, %v203_v11  ;;  %v937_v31 = vld [vmem:[%s1085_s0 + $0x30] sm:$0xff] }
   0x5   :  { %v26_v16 = vand.u32 2147483647, %v24_v5  ;;  %v25_v20 = vand.u32 2147483647, %v23_v10  ;;  %v204_v22 = vand.u32 2147483647, %v202_v12  ;;  %v565_v23 = vsub.f32 %v926_v15, %v20_v0 }
   0x6   :  { %v386_v25 = vand.u32 2147483647, %v384_v18  ;;  %v385_v26 = vand.u32 2147483647, %v383_v19  ;;  %v207_v28 = vmin.f32 %v205_v21, 1.0  ;;  %v60_v33 = vsub.f32 %v898_v7, %v929_v17 }
   0x7   :  { %v28_v24 = vmin.f32 %v26_v16, 1.0  ;;  %v27_v27 = vmin.f32 %v25_v20, 1.0  ;;  %v206_v29 = vmin.f32 %v204_v22, 1.0  ;;  %v567_v30 = vand.u32 2147483647, %v565_v23 }
   0x8   :  { %v388_v34 = vmin.f32 %v386_v25, 1.0  ;;  %v387_v35 = vmin.f32 %v385_v26, 1.0  ;;  %v209_v37 = vmul.f32 0.5, %v207_v28  ;;  %v564_v43 = vsub.f32 %v937_v31, %v19_v2 }
   0x9   :  { %v30_v32 = vmul.f32 0.5, %v28_v24  ;;  %v29_v36 = vmul.f32 0.5, %v27_v27  ;;  %v208_v38 = vmul.f32 0.5, %v206_v29  ;;  %v569_v39 = vmin.f32 %v567_v30, 1.0 }
   0xa   :  { %v390_v41 = vmul.f32 0.5, %v388_v34  ;;  %v389_v42 = vmul.f32 0.5, %v387_v35  ;;  %v211_v45 = vsub.f32 %v205_v21, %v209_v37  ;;  %v566_v51 = vand.u32 2147483647, %v564_v43 }
   0xb   :  { %v32_v40 = vsub.f32 %v26_v16, %v30_v32  ;;  %v31_v44 = vsub.f32 %v25_v20, %v29_v36  ;;  %v210_v46 = vsub.f32 %v204_v22, %v208_v38  ;;  %v571_v47 = vmul.f32 0.5, %v569_v39 }
   0xc   :  { %v392_v49 = vsub.f32 %v386_v25, %v390_v41  ;;  %v391_v50 = vsub.f32 %v385_v26, %v389_v42  ;;  %v213_v53 = vmul.f32 %v211_v45, %v207_v28  ;;  %v942_v57 = vand.u32 4294901760, %v60_v33 }
   0xd   :  { %v34_v48 = vmul.f32 %v32_v40, %v28_v24  ;;  %v33_v52 = vmul.f32 %v31_v44, %v27_v27  ;;  %v212_v54 = vmul.f32 %v210_v46, %v206_v29  ;;  %v573_v55 = vsub.f32 %v567_v30, %v571_v47 }
   0xe   :  { %v394_v58 = vmul.f32 %v392_v49, %v388_v34  ;;  %v568_v59 = vmin.f32 %v566_v51, 1.0  ;;  %v228_v61 = vand.u32 4294901760, %v213_v53  ;;  %v393_v63 = vmul.f32 %v391_v50, %v387_v35 }
   0xf   :  { %v53_v56 = vand.u32 4294901760, %v34_v48  ;;  %v55_v60 = vand.u32 4294901760, %v33_v52  ;;  %v944_v62 = vand.u32 4294901760, %v212_v54  ;;  %v575_v4 = vmul.f32 %v573_v55, %v569_v39  ;;  %v1030_v55 = vld [vmem:[%s1087_s2 + $0x2] sm:$0x1] }
  0x10   :  { %v946_v2 = vand.u32 4294901760, %v394_v58  ;;  %v570_v5 = vmul.f32 0.5, %v568_v59  ;;  %v256_v11 = vsub.f32 %v213_v53, %v228_v61  ;;  %v950_v22 = vand.u32 4294901760, %v393_v63  ;;  %v1023_v53 = vld [vmem:[%s1087_s2 + $0x1] sm:$0x1] }
  0x11   :  { %54 = vmatpush.msra.mxu0 %v53_v56  ;;  %v81_v0 = vsub.f32 %v34_v48, %v53_v56  ;;  %138 = vmatpush.msra.mxu3 %v53_v56  ;;  %v87_v10 = vsub.f32 %v33_v52, %v55_v60  ;;  %v262_v12 = vsub.f32 %v212_v54, %v944_v62  ;;  %v956_v25 = vand.u32 4294901760, %v575_v4  ;;  %v1018_v52 = vld [vmem:[%s1087_s2] sm:$0x1] }
  0x12   :  { %v572_v18 = vsub.f32 %v566_v51, %v570_v5  ;;  %v257_v19 = vand.u32 4294901760, %v256_v11  ;;  %v954_v24 = vsub.f32 %v394_v58, %v946_v2  ;;  %v443_v36 = vsub.f32 %v393_v63, %v950_v22 }
  0x13   :  { %113 = vmatpush.msra.mxu2 %v81_v0  ;;  %56 = vmatpush.msra.mxu0 %v55_v60  ;;  %v82_v16 = vand.u32 4294901760, %v81_v0  ;;  %v88_v20 = vand.u32 4294901760, %v87_v10  ;;  %v263_v21 = vand.u32 4294901760, %v262_v12  ;;  %v618_v38 = vsub.f32 %v575_v4, %v956_v25 }
  0x14   :  { %140 = vmatpush.msra.mxu3 %v55_v60  ;;  %62 = vmatmul.f32.vlgmr.msra.gmra.mxu0 %v942_v57  ;;  %v574_v26 = vmul.f32 %v572_v18, %v568_v59  ;;  %v258_v27 = vsub.f32 %v256_v11, %v257_v19  ;;  %v438_v37 = vand.u32 4294901760, %v954_v24  ;;  %v847_v40 = vmov 1.0  }
  0x15   :  { %116 = vmatpush.msra.mxu2 %v87_v10  ;;  %144 = vmatmul.f32.vlgmr.msra.gmra.mxu3 %v929_v17  ;;  %v83_v23 = vsub.f32 %v81_v0, %v82_v16  ;;  %v89_v28 = vsub.f32 %v87_v10, %v88_v20  ;;  %v264_v29 = vsub.f32 %v262_v12, %v263_v21  ;;  %v444_v41 = vand.u32 4294901760, %v443_v36 }
  0x16   :  { %119 = vmatmul.f32.vlgmr.msra.gmra.mxu2 %v898_v7  ;;  %165 = vmatpush.msrb.mxu0 %v82_v16  ;;  %v959_v32 = vand.u32 4294901760, %v574_v26  ;;  %v259_v33 = vand.u32 4294901760, %v258_v27  ;;  %v439_v42 = vsub.f32 %v954_v24, %v438_v37  ;;  %v619_v43 = vand.u32 4294901760, %v618_v38 }
  0x17   :  { %229 = vmatpush.msrb.mxu2 %v228_v61  ;;  %v84_v30 = vand.u32 4294901760, %v83_v23  ;;  %v90_v34 = vand.u32 4294901760, %v89_v28  ;;  %v265_v35 = vand.u32 4294901760, %v264_v29  ;;  %v445_v45 = vsub.f32 %v443_v36, %v444_v41 }
  0x18   :  { %169 = vmatpush.msrb.mxu0 %v88_v20  ;;  %260 = vmatpush.msrb.mxu3 %v259_v33  ;;  %v624_v39 = vsub.f32 %v574_v26, %v959_v32  ;;  %v440_v46 = vand.u32 4294901760, %v439_v42  ;;  %v620_v47 = vsub.f32 %v618_v38, %v619_v43 }
  0x19   :  { %85 = vmatpush.msra.mxu1 %v84_v30  ;;  %231 = vmatpush.msrb.mxu2 %v944_v62  ;;  %v446_v49 = vand.u32 4294901760, %v445_v45 }
  0x1a   :  { %288 = vmatpush.msra.mxu0 %v256_v11  ;;  %266 = vmatpush.msrb.mxu3 %v265_v35  ;;  %v625_v44 = vand.u32 4294901760, %v624_v39  ;;  %v621_v50 = vand.u32 4294901760, %v620_v47 }
  0x1b   :  { %340 = vmatpush.msra.mxu2 %v257_v19  ;;  %91 = vmatpush.msra.mxu1 %v90_v34  ;;  %v832_v19 = vld [vmem:[%s1087_s2 + $0x3] sm:$0x1] }
  0x1c   :  { %809 = vmatmul.msk.f32.vlgmr.msra.gmra.mxu1 %vm35_vm0, %v847_v40  ;;  %810 = vmatmul.msk.f32.vlgmr.msrb.gmra.mxu0 %vm35_vm0, %v847_v40  ;;  %v626_v48 = vsub.f32 %v624_v39, %v625_v44 }
  0x1d   :  { %190 = vmatpush.msrb.mxu1 %v53_v56  ;;  %814 = vmatmul.msk.f32.vlgmr.msrb.gmra.mxu3 %vm35_vm0, %v847_v40  ;;  %v1036_v56 = vld [vmem:[%s1087_s2 + $0x3] sm:$0x1] }
  0x1e   :  { %237 = vmatmul.f32.vlgmr.msrb.gmra.mxu2 %v942_v57  ;;  %365 = vmatpush.msra.mxu3 %v228_v61  ;;  %v627_v51 = vand.u32 4294901760, %v626_v48 }
  0x1f   :  { %192 = vmatpush.msrb.mxu1 %v55_v60  ;;  %344 = vmatpush.msra.mxu2 %v263_v21 }
  0x20   :  { %291 = vmatpush.msra.mxu0 %v262_v12  ;;  %367 = vmatpush.msra.mxu3 %v944_v62 }
  0x21   :  { %313 = vmatpush.msra.mxu1 %v228_v61  ;;  %469 = vmatpush.msrb.mxu2 %v954_v24 }
  0x22   :  { %410 = vmatpush.msrb.mxu0 %v946_v2  ;;  %494 = vmatpush.msrb.mxu3 %v946_v2 }
  0x23   :  { %315 = vmatpush.msra.mxu1 %v944_v62  ;;  %472 = vmatpush.msrb.mxu2 %v443_v36  ;;  %v830_v62 = vld [vmem:[%s1087_s2 + $0x1] sm:$0x1] }
  0x24   :  { %811 = vmatmul.msk.f32.vlgmr.msrb.gmra.mxu1 %vm35_vm0, %v847_v40  ;;  %294 = vmatmul.f32.vlgmr.msra.gmra.mxu0 %v898_v7 }
  0x25   :  { %441 = vmatpush.msrb.mxu1 %v440_v46  ;;  %816 = vmatmul.msk.f32.vlgmr.msra.gmra.mxu3 %vm35_vm0, %v847_v40 }
  0x26   :  { %815 = vmatmul.msk.f32.vlgmr.msra.gmra.mxu2 %vm35_vm0, %v847_v40  ;;  %412 = vmatpush.msrb.mxu0 %v950_v22 }
  0x27   :  { %496 = vmatpush.msrb.mxu3 %v950_v22  ;;  %447 = vmatpush.msrb.mxu1 %v446_v49 }
  0x28   :  { %591 = vmatpush.msra.mxu2 %v956_v25  ;;  %521 = vmatpush.msra.mxu0 %v438_v37 }
  0x29   :  { %622 = vmatpush.msra.mxu3 %v621_v50 }
  0x2a   :  { %593 = vmatpush.msra.mxu2 %v959_v32  ;;  %525 = vmatpush.msra.mxu0 %v444_v41 }
  0x2b   :  { %628 = vmatpush.msra.mxu3 %v627_v51 }
  0x2c   :  { %319 = vmatmul.f32.vlgmr.msra.gmra.mxu1 %v929_v17  ;;  %418 = vmatmul.f32.vlgmr.msrb.gmra.mxu0 %v942_v57 }
  0x2d   :  { %546 = vmatpush.msra.mxu1 %v946_v2  ;;  %500 = vmatmul.f32.vlgmr.msrb.gmra.mxu3 %v929_v17  ;;  %v831_v2 = vld [vmem:[%s1087_s2 + $0x2] sm:$0x1] }
  0x2e   :  { %475 = vmatmul.f32.vlgmr.msrb.gmra.mxu2 %v898_v7  ;;  %650 = vmatpush.msrb.mxu0 %v618_v38 }
  0x2f   :  { %548 = vmatpush.msra.mxu1 %v950_v22  ;;  %702 = vmatpush.msrb.mxu2 %v619_v43 }
  0x30   :  { %727 = vmatpush.msrb.mxu3 %v956_v25  ;;  %653 = vmatpush.msrb.mxu0 %v624_v39 }
  0x31   :  { %706 = vmatpush.msrb.mxu2 %v625_v44 }
  0x32   :  { %729 = vmatpush.msrb.mxu3 %v959_v32 }
  0x34   :  { %820 = vmatmul.msk.f32.vlgmr.msrb.gmra.mxu1 %vm35_vm0, %v847_v40  ;;  %821 = vmatmul.msk.f32.vlgmr.msra.gmra.mxu0 %vm35_vm0, %v847_v40 }
  0x35   :  { %675 = vmatpush.msrb.mxu1 %v956_v25  ;;  %826 = vmatmul.msk.f32.vlgmr.msra.gmra.mxu3 %vm35_vm0, %v847_v40 }
  0x36   :  { %599 = vmatmul.f32.vlgmr.msra.gmra.mxu2 %v942_v57 }
  0x37   :  { %677 = vmatpush.msrb.mxu1 %v959_v32 }
  0x3c   :  { %822 = vmatmul.msk.f32.vlgmr.msra.gmra.mxu1 %vm35_vm0, %v847_v40  ;;  %656 = vmatmul.f32.vlgmr.msrb.gmra.mxu0 %v898_v7  ;;  %v379_v7 = vmax.f32 %v1018_v52, %v1023_v53 }
  0x3d   :  { %828 = vmatmul.msk.f32.vlgmr.msrb.gmra.mxu3 %vm35_vm0, %v847_v40 }
  0x3e   :  { %827 = vmatmul.msk.f32.vlgmr.msrb.gmra.mxu2 %vm35_vm0, %v847_v40 }
  0x44   :  { %681 = vmatmul.f32.vlgmr.msrb.gmra.mxu1 %v929_v17  ;;  %v560_v17 = vmax.f32 %v379_v7, %v1030_v55 }
  0x46   :  { %v1039_v58 = vmax.f32 %v560_v17, %v1036_v56 }
  0x48   :  { %v762_v63 = vsub.f32 %v1018_v52, %v1039_v58  ;;  %v766_v0 = vsub.f32 %v830_v62, %v1039_v58  ;;  %v771_v12 = vsub.f32 %v831_v2, %v1039_v58  ;;  %v776_v21 = vsub.f32 %v832_v19, %v1039_v58 }
  0x49   :  { %v848_v19 = vmov 0.0  }
  0x4a   :  { %v763_v4 = vmul.f32 1.442695, %v762_v63  ;;  %v767_v11 = vmul.f32 1.442695, %v766_v0  ;;  %v772_v20 = vmul.f32 1.442695, %v771_v12 }
  0x4b   :  { %v777_v24 = vmul.f32 1.442695, %v776_v21 }
  0x4c   :  { %836 = vpow2.f32 %v763_v4 }
  0x4d   :  { %838 = vpow2.f32 %v767_v11 }
  0x4e   :  { %840 = vpow2.f32 %v772_v20 }
  0x4f   :  { %842 = vpow2.f32 %v777_v24 }
  0x52   :  { %v837_v25 = vpop.eup %836 }
  0x53   :  { %v839_v28 = vpop.eup %838 }
  0x54   :  { %v769_v32 = vadd.f32 %v839_v28, %v837_v25  ;;  %v841_v33 = vpop.eup %840 }
  0x55   :  { %v843_v41 = vpop.eup %842 }
  0x56   :  { %v774_v40 = vadd.f32 %v841_v33, %v769_v32 }
  0x58   :  { %v779_v46 = vadd.f32 %v843_v41, %v774_v40 }
  0x5a   :  { %844 = vlog2.f32 %v779_v46 }
  0x60   :  { %v845_v63 = vpop.eup %844 }
  0x91   :  { %v63_v54 = vpop.f32.mrf.mxu0 }
  0x98   :  { %v145_v57 = vpop.f32.mrf.mxu3 }
  0x99   :  { %v94_v59 = vpop.f32.mrf.mxu1  ;;  %v120_v60 = vpop.f32.mrf.mxu2 }
  0x9a   :  { %v172_v61 = vpop.f32.mrf.mxu0  ;;  %v95_v29 = vadd.f32 %v94_v59, %v63_v54 }
  0x9c   :  { %v121_v36 = vadd.f32 %v120_v60, %v95_v29 }
  0x9e   :  { %v146_v45 = vadd.f32 %v145_v57, %v121_v36 }
  0xa0   :  { %v269_v16 = vpop.f32.mrf.mxu3  ;;  %v173_v51 = vadd.f32 %v172_v61, %v146_v45 }
  0xa1   :  { %v195_v5 = vpop.f32.mrf.mxu1  ;;  %v238_v10 = vpop.f32.mrf.mxu2 }
  0xa2   :  { %v295_v18 = vpop.f32.mrf.mxu0  ;;  %v270_v30 = vadd.f32 %v269_v16, %v238_v10  ;;  %v196_v62 = vadd.f32 %v195_v5, %v173_v51  ;;  %v781_v16 = vmul.f32 0.6931472, %v845_v63  ;;  %v784_v5 = vld [vmem:[%s1088_s3] sm:$0x1] }
  0xa4   :  { %v296_v37 = vadd.f32 %v295_v18, %v270_v30 }
  0xa8   :  { %v370_v26 = vpop.f32.mrf.mxu3 }
  0xa9   :  { %v320_v22 = vpop.f32.mrf.mxu1  ;;  %v347_v23 = vpop.f32.mrf.mxu2 }
  0xaa   :  { %v419_v27 = vpop.f32.mrf.mxu0  ;;  %v321_v43 = vadd.f32 %v320_v22, %v296_v37 }
  0xac   :  { %v348_v47 = vadd.f32 %v347_v23, %v321_v43  ;;  %v782_v23 = vadd.f32 %v781_v16, %v1039_v58 }
  0xae   :  { %v371_v54 = vadd.f32 %v370_v26, %v348_v47 }
  0xb0   :  { %v501_v39 = vpop.f32.mrf.mxu3  ;;  %vm375_vm1 = vcmp.lt.f32.partialorder %v371_v54, %v196_v62 }
  0xb1   :  { %v450_v34 = vpop.f32.mrf.mxu1  ;;  %v476_v35 = vpop.f32.mrf.mxu2  ;;  %v376_v11 = vsel %vm375_vm1, %v371_v54, %v196_v62  ;;  %v377_v20 = vsel %vm375_vm1, 1.0, %v848_v19  ;;  %v378_v21 = vsel %vm375_vm1, %v1023_v53, %v1018_v52 }
  0xb2   :  { %v451_v38 = vadd.f32 %v450_v34, %v419_v27  ;;  %v528_v42 = vpop.f32.mrf.mxu0 }
  0xb4   :  { %v477_v44 = vadd.f32 %v476_v35, %v451_v38 }
  0xb6   :  { %v502_v48 = vadd.f32 %v501_v39, %v477_v44 }
  0xb8   :  { %v631_v7 = vpop.f32.mrf.mxu3  ;;  %v529_v17 = vadd.f32 %v528_v42, %v502_v48 }
  0xb9   :  { %v551_v49 = vpop.f32.mrf.mxu1  ;;  %v600_v50 = vpop.f32.mrf.mxu2 }
  0xba   :  { %v632_v59 = vadd.f32 %v631_v7, %v600_v50  ;;  %v657_v60 = vpop.f32.mrf.mxu0  ;;  %v552_v0 = vadd.f32 %v551_v49, %v529_v17 }
  0xbc   :  { %v658_v2 = vadd.f32 %v657_v60, %v632_v59  ;;  %vm556_vm2 = vcmp.lt.f32.partialorder %v552_v0, %v376_v11 }
  0xbd   :  { %v557_v22 = vsel %vm556_vm2, %v552_v0, %v376_v11  ;;  %v558_v24 = vsel %vm556_vm2, 2.0, %v377_v20  ;;  %v559_v25 = vsel %vm556_vm2, %v1030_v55, %v378_v21 }
  0xc0   :  { %v732_v12 = vpop.f32.mrf.mxu3 }
  0xc1   :  { %v682_v4 = vpop.f32.mrf.mxu1  ;;  %v709_v10 = vpop.f32.mrf.mxu2 }
  0xc2   :  { %v683_v57 = vadd.f32 %v682_v4, %v658_v2 }
  0xc4   :  { %v710_v18 = vadd.f32 %v709_v10, %v683_v57 }
  0xc6   :  { %v733_v61 = vadd.f32 %v732_v12, %v710_v18 }
  0xc8   :  { %vm737_vm3 = vcmp.lt.f32.partialorder %v733_v61, %v557_v22 }
  0xc9   :  { %v739_v26 = vsel %vm737_vm3, 3.0, %v558_v24  ;;  %v740_v27 = vsel %vm737_vm3, %v1036_v56, %v559_v25  ;;  %v738_v28 = vsel %vm737_vm3, %v733_v61, %v557_v22 }
  0xca   :  { %vm742_vm5 = vcmp.eq.f32.partialorder %v739_v26, 1.0  ;;  %vm748_vm6 = vcmp.eq.f32.partialorder %v739_v26, 2.0  ;;  %vm754_vm7 = vcmp.eq.f32.partialorder %v739_v26, 3.0  ;;  %v785_v52 = vmul.f32 %v784_v5, %v738_v28 }
  0xcb   :  { %v743_v53 = vsel %vm742_vm5, 1, %v846_v3  ;;  %v749_v29 = vsel %vm748_vm6, 1, %v846_v3  ;;  %v755_v30 = vsel %vm754_vm7, 1, %v846_v3  ;;  %v783_v58 = vsub.f32 %v782_v23, %v740_v27 }
  0xcc   :  { %v744_v32 = vperm.slane %v743_v53, 0  ;;  %v750_v33 = vperm.slane %v749_v29, 0  ;;  %v756_v55 = vperm.slane %v755_v30, 0  ;;  %v787_v34 = vsel %vm786_vm4, %v785_v52, 0.0 }
  0xcd   :  { %788 = vadd.xlane.f32.xlu0 %v787_v34  ;;  %v791_v3 = vmul.f32 %v784_v5, %v783_v58 }
  0xce   :  { %vm745_vm8 = vcmp.eq.s32.totalorder %v744_v32, 1  ;;  %vm751_vm9 = vcmp.eq.s32.totalorder %v750_v33, 1  ;;  %vm757_vm10 = vcmp.eq.s32.totalorder %v756_v55, 1 }
  0xcf   :  { %v746_v56 = vsel %vm745_vm8, %v908_v9, %v896_v6  ;;  %v747_v35 = vsel %vm745_vm8, %v903_v8, %v885_v1  ;;  %v792_v1 = vsel %vm786_vm4, %v791_v3, 0.0  ;;  %v795_v6 = vlaneseq }
  0xd0   :  { %v752_v36 = vsel %vm751_vm9, %v921_v14, %v746_v56  ;;  %v753_v37 = vsel %vm751_vm9, %v916_v13, %v747_v35 }
  0xd1   :  { %v758_v38 = vsel %vm757_vm10, %v937_v31, %v752_v36  ;;  %v759_v39 = vsel %vm757_vm10, %v926_v15, %v753_v37  ;;  %v796_v9 = vand.u32 127, %v795_v6 }
  0xd2   :  { %760 = vst [vmem:[%s1089_s4] sm:$0xff] %v758_v38 }
  0xd3   :  { %761 = vst [vmem:[%s1089_s4 + $0x8] sm:$0xff] %v759_v39  ;;  %vm797_vm11 = vcmp.eq.s32.totalorder %v796_v9, 0 }
  0xd5   :  { %793 = vadd.xlane.f32.xlu0 %v792_v1 }
 0x140   :  { %v789_v8 = vpop.xlane.xlu0 %788 }
 0x141   :  { %v790_v13 = vmul.f32 0.0625, %v789_v8 }
 0x148   :  { %v794_v14 = vpop.xlane.xlu0 %793 }
 0x149   :  { %v798_v31 = vsel %vm797_vm11, %v790_v13, %v794_v14 }
 0x14a   :  { %800 = vst.msk [vmem:[%s1090_s5] sm:$0x1] %vm799_vm12, %v798_v31 }

</bundles_post_ra>
